<compile_context>
chip_gen: v7x
topology: tpu7x:2x2x1
jax: 0.10.0
libtpu: 0.0.40
codegen_flags: <defaults>
</compile_context>

<pallas_src>
import functools
import math

import jax
import jax.numpy as jnp
from jax.experimental import pallas as pl
from jax.experimental.pallas import tpu as pltpu


# ---------------------------------------------------------------------------
# Kernels
# ---------------------------------------------------------------------------

def _ein_kernel(x_ref, w_ref, o_ref, *, n_models):
    """Single-pass kernel: one 2-D MXU matmul per model for this B tile.

    x_ref: (TB, E, I)   w_ref: (E, I, O_pad)   o_ref: (TB, E, O_pad)
    """
    for e in range(n_models):
        y = jnp.dot(x_ref[:, e, :], w_ref[e], preferred_element_type=jnp.float32)
        o_ref[:, e, :] = y.astype(o_ref.dtype)


def _ein_kernel_ktiled_inplace(x_ref, w_ref, o_ref, *, n_models):
    """K-tiled kernel, f32 output: accumulate partial products directly in o_ref
    (the output block is resident across k because its index_map ignores k)."""
    k = pl.program_id(1)

    @pl.when(k == 0)
    def _init():
        o_ref[...] = jnp.zeros_like(o_ref)

    for e in range(n_models):
        o_ref[:, e, :] += jnp.dot(x_ref[:, e, :], w_ref[e],
                                  preferred_element_type=jnp.float32)


def _ein_kernel_ktiled_acc(x_ref, w_ref, o_ref, acc_ref, *, n_models):
    """K-tiled kernel, non-f32 output: accumulate in an f32 VMEM scratch."""
    k = pl.program_id(1)

    @pl.when(k == 0)
    def _init():
        acc_ref[...] = jnp.zeros_like(acc_ref)

    for e in range(n_models):
        acc_ref[:, e, :] += jnp.dot(x_ref[:, e, :], w_ref[e],
                                    preferred_element_type=jnp.float32)

    @pl.when(k == pl.num_programs(1) - 1)
    def _done():
        o_ref[...] = acc_ref[...].astype(o_ref.dtype)


# ---------------------------------------------------------------------------
# Tile / VMEM sizing
# ---------------------------------------------------------------------------

def _round_up(v, m):
    return ((v + m - 1) // m) * m


def _vmem_budget_and_limit():
    """Generation-aware VMEM sizing (v7x only has 64 MiB per TensorCore)."""
    cap = None
    try:
        cap = getattr(pltpu.get_tpu_info(), "vmem_capacity_bytes", None)
    except Exception:
        cap = None
    if not cap:
        cap = 64 * 1024 * 1024                      # safe default for every generation
    budget = min(int(cap * 0.40), 96 * 1024 * 1024)
    limit = min(int(cap * 0.75), 112 * 1024 * 1024)
    return budget, limit


def _tb_candidates(B, sub):
    """B-tile candidates (largest first), aligned to the dtype's sublane packing.
    When B is large enough, cap the first candidate at ~B/2 so the 'parallel'
    grid axis has >= 2 steps (feeds both v7x TensorCores)."""
    if B < 2 * sub:
        cands = [B]
    else:
        cands = [_round_up(pl.cdiv(B, 2), sub)]
    for t in (4096, 2048, 1024, 512, 256, 128, 64, 32, 16, 8):
        if t >= sub and t < cands[0] and t < B:
            cands.append(t)
    return cands


def _choose_tiles(E, B, I, O, itemsize, sub, budget_bytes):
    """Pick (TB, TK).  TK always divides I exactly; prefer TK == I (single pass,
    weight read from HBM exactly once and kept VMEM-resident) and shrink TB first."""
    # NOTE: the resident weight block is still counted double-buffered (default
    # BlockSpec behaviour); pl.Buffered(1) would reclaim that second buffer.
    w_full = 2 * E * I * O * itemsize

    def xo_bytes(tb, tk, with_acc):
        b = 2 * E * tb * tk * itemsize + 2 * E * tb * O * itemsize
        if with_acc:
            b += tb * E * O * 4                     # f32 accumulator (worst case)
        return b

    tbs = _tb_candidates(B, sub)

    # Single-pass (TK == I) first.
    for tb in tbs:
        if w_full + xo_bytes(tb, I, False) <= budget_bytes:
            return tb, I

    # K-tiled fallback; 256-granular TK fills the v6e/v7x 256-wide MXU.
    tks = []
    for g in (256, 128):
        if I % g == 0:
            units = I // g
            tks = [g * d for d in range(units - 1, 0, -1) if units % d == 0]
            break
    for tk in tks:
        wk = 2 * E * tk * O * itemsize
        for tb in tbs:
            if wk + xo_bytes(tb, tk, True) <= budget_bytes:
                return tb, tk

    # TODO(synk): very large E*O would additionally need an O-tiling grid axis.
    return min(B, sub), (tks[-1] if tks else I)


# ---------------------------------------------------------------------------
# Wrapper (PyTorch convention: inp (B,E,I), weight (E,O,I) -> (B,E,O))
# ---------------------------------------------------------------------------

def ein_linear(inp, weight, bias=None, *, compute_dtype=None, pad_out_lanes=True,
               vmem_budget_bytes=None):
    """EinLinear forward: einsum('eoi,bei->beo', weight, inp)."""
    if bias is not None:
        # Matches the PyTorch module, which raises in forward when bias is set.
        raise RuntimeError("EinLinear bias path is not supported")

    B, E, I = inp.shape
    E_w, O, I_w = weight.shape
    assert E == E_w and I == I_w
    out_dtype = inp.dtype

    # One-time parameter prep (tiny vs. activations): (E,O,I) -> (E,I,O_pad).
    w_io = jnp.swapaxes(weight, 1, 2)               # (E, I, O)
    O_pad = _round_up(O, 128) if pad_out_lanes else O
    if O_pad != O:
        w_io = jnp.pad(w_io, ((0, 0), (0, 0), (0, O_pad - O)))

    # Cast in the wrapper, not in the kernel (halves HBM bytes of casted operands).
    x = inp if compute_dtype is None else inp.astype(compute_dtype)
    if compute_dtype is not None:
        w_io = w_io.astype(compute_dtype)

    itemsize = jnp.dtype(x.dtype).itemsize
    sub = 8 if itemsize >= 4 else (16 if itemsize == 2 else 32)

    budget, vmem_limit = _vmem_budget_and_limit()
    if vmem_budget_bytes is not None:
        budget = vmem_budget_bytes

    TB, TK = _choose_tiles(E, B, I, O_pad, itemsize, sub, budget)
    nb = pl.cdiv(B, TB)
    nk = I // TK

    if nk == 1:
        grid = (nb,)
        in_specs = [
            pl.BlockSpec((TB, E, I), lambda b: (b, 0, 0)),
            # Constant index_map: the whole (padded) weight stays VMEM-resident
            # across all B tiles and is DMA'd from HBM exactly once.
            pl.BlockSpec((E, I, O_pad), lambda b: (0, 0, 0)),
        ]
        out_specs = pl.BlockSpec((TB, E, O_pad), lambda b: (b, 0, 0))
        scratch_shapes = []
        kernel = functools.partial(_ein_kernel, n_models=E)
        dims = ("parallel",)
    else:
        grid = (nb, nk)                             # reduction axis last
        in_specs = [
            pl.BlockSpec((TB, E, TK), lambda b, k: (b, 0, k)),
            pl.BlockSpec((E, TK, O_pad), lambda b, k: (0, k, 0)),
        ]
        out_specs = pl.BlockSpec((TB, E, O_pad), lambda b, k: (b, 0, 0))
        if jnp.dtype(out_dtype) == jnp.dtype(jnp.float32):
            scratch_shapes = []                     # accumulate directly in o_ref
            kernel = functools.partial(_ein_kernel_ktiled_inplace, n_models=E)
        else:
            scratch_shapes = [pltpu.VMEM((TB, E, O_pad), jnp.float32)]
            kernel = functools.partial(_ein_kernel_ktiled_acc, n_models=E)
        dims = ("parallel", "arbitrary")

    out_pad = pl.pallas_call(
        kernel,
        out_shape=jax.ShapeDtypeStruct((B, E, O_pad), out_dtype),
        grid_spec=pltpu.PrefetchScalarGridSpec(
            num_scalar_prefetch=0,
            grid=grid,
            in_specs=in_specs,
            out_specs=out_specs,
            scratch_shapes=scratch_shapes,
        ),
        compiler_params=pltpu.CompilerParams(
            dimension_semantics=dims,
            vmem_limit_bytes=vmem_limit,
        ),
    )(x, w_io)

    return out_pad if O_pad == O else out_pad[:, :, :O]


def init_einlinear_params(key, n_models, in_features, out_features):
    """Deterministic kaiming_uniform_(a=sqrt(5)) equivalent per model -> (E, O, I)."""
    bound = 1.0 / math.sqrt(in_features)
    return jax.random.uniform(key, (n_models, out_features, in_features),
                              minval=-bound, maxval=bound, dtype=jnp.float32)


# ---------------------------------------------------------------------------
# Demo / correctness checks
# ---------------------------------------------------------------------------

if __name__ == "__main__":
    key = jax.random.PRNGKey(0)
    k_w, k_x, k_w2, k_x2 = jax.random.split(key, 4)

    # --- Test 1: small shapes (single grid step; no K tiling; O padded to 128)
    B, E, I, O = 8, 4, 32, 16
    weight = init_einlinear_params(k_w, E, I, O)                  # (E, O, I)
    x = jax.random.normal(k_x, (B, E, I), dtype=jnp.float32)      # (B, E, I)

    out = jax.block_until_ready(ein_linear(x, weight))
    ref = jnp.einsum("eoi,bei->beo", weight, x)
    assert out.shape == (B, E, O)
    assert jnp.allclose(out, ref, atol=1e-4, rtol=1e-4)

    # --- Test 2: bf16 MXU fast path (operands cast in the wrapper, f32 accumulation)
    out_bf16 = jax.block_until_ready(ein_linear(x, weight, compute_dtype=jnp.bfloat16))
    assert jnp.allclose(out_bf16, ref, atol=5e-2, rtol=5e-2)

    # --- Test 3: K-tiled in-place accumulation path (forced via a tiny VMEM budget)
    B2, E2, I2, O2 = 64, 2, 512, 128
    w2 = init_einlinear_params(k_w2, E2, I2, O2)                  # (E2, O2, I2)
    x2 = jax.random.normal(k_x2, (B2, E2, I2), dtype=jnp.float32)
    out2 = jax.block_until_ready(ein_linear(x2, w2, vmem_budget_bytes=1 << 20))
    ref2 = jnp.einsum("eoi,bei->beo", w2, x2)
    assert out2.shape == (B2, E2, O2)
    assert jnp.allclose(out2, ref2, atol=1e-3, rtol=1e-3)

    print("KERNEL_OK")
</pallas_src>

<mosaic_0001>
module attributes {stable_mosaic.version = 11 : i64} {
  func.func @_ein_kernel(%arg0: i32, %arg1: memref<8x4x32xf32, #tpu.memory_space<vmem>>, %arg2: memref<4x32x128xf32, #tpu.memory_space<vmem>>, %arg3: memref<8x4x128xf32, #tpu.memory_space<vmem>>) attributes {dimension_semantics = [#tpu.dimension_semantics<parallel>], iteration_bounds = array<i64: 1>, scalar_prefetch = 0 : i64, scratch_operands = 0 : i64, tpu.core_type = #tpu.core_type<tc>, window_params = [{transform_indices = @transform_0, window_bounds = array<i64: 8, 4, 32>}, {pipeline_mode = #tpu.pipeline_mode<synchronous>, transform_indices = @transform_1, window_bounds = array<i64: 4, 32, 128>}, {transform_indices = @transform_2, window_bounds = array<i64: 8, 4, 128>}]} {
    %c0 = arith.constant 0 : index
    %c0_0 = arith.constant 0 : index
    %c0_1 = arith.constant 0 : index
    %0 = vector.load %arg1[%c0, %c0_0, %c0_1] : memref<8x4x32xf32, #tpu.memory_space<vmem>>, vector<8x1x32xf32>
    %1 = vector.shape_cast %0 : vector<8x1x32xf32> to vector<8x32xf32>
    %c0_2 = arith.constant 0 : index
    %c0_3 = arith.constant 0 : index
    %c0_4 = arith.constant 0 : index
    %2 = vector.load %arg2[%c0_2, %c0_3, %c0_4] : memref<4x32x128xf32, #tpu.memory_space<vmem>>, vector<1x32x128xf32>
    %3 = vector.shape_cast %2 : vector<1x32x128xf32> to vector<32x128xf32>
    %cst = arith.constant dense<0.000000e+00> : vector<8x128xf32>
    %4 = tpu.matmul %1, %3, %cst {dimension_numbers = #tpu.dot_dimension_numbers<[1], [0], [0], [1], [0, 0, 1, 1], [], []>} : vector<8x32xf32>, vector<32x128xf32>, vector<8x128xf32> -> vector<8x128xf32>
    %c0_5 = arith.constant 0 : index
    %c0_6 = arith.constant 0 : index
    %c0_7 = arith.constant 0 : index
    %5 = vector.load %arg3[%c0_5, %c0_6, %c0_7] : memref<8x4x128xf32, #tpu.memory_space<vmem>>, vector<8x1x128xf32>
    %6 = vector.shape_cast %5 : vector<8x1x128xf32> to vector<8x128xf32>
    %7 = vector.shape_cast %4 : vector<8x128xf32> to vector<8x1x128xf32>
    tpu.vector_store %arg3[%c0_5, %c0_6, %c0_7], %7 {strides = array<i32>} : memref<8x4x128xf32, #tpu.memory_space<vmem>>, vector<8x1x128xf32>,
    %c0_8 = arith.constant 0 : index
    %c1 = arith.constant 1 : index
    %c0_9 = arith.constant 0 : index
    %8 = vector.load %arg1[%c0_8, %c1, %c0_9] : memref<8x4x32xf32, #tpu.memory_space<vmem>>, vector<8x1x32xf32>
    %9 = vector.shape_cast %8 : vector<8x1x32xf32> to vector<8x32xf32>
    %c1_10 = arith.constant 1 : index
    %c0_11 = arith.constant 0 : index
    %c0_12 = arith.constant 0 : index
    %10 = vector.load %arg2[%c1_10, %c0_11, %c0_12] : memref<4x32x128xf32, #tpu.memory_space<vmem>>, vector<1x32x128xf32>
    %11 = vector.shape_cast %10 : vector<1x32x128xf32> to vector<32x128xf32>
    %cst_13 = arith.constant dense<0.000000e+00> : vector<8x128xf32>
    %12 = tpu.matmul %9, %11, %cst_13 {dimension_numbers = #tpu.dot_dimension_numbers<[1], [0], [0], [1], [0, 0, 1, 1], [], []>} : vector<8x32xf32>, vector<32x128xf32>, vector<8x128xf32> -> vector<8x128xf32>
    %c0_14 = arith.constant 0 : index
    %c1_15 = arith.constant 1 : index
    %c0_16 = arith.constant 0 : index
    %13 = vector.load %arg3[%c0_14, %c1_15, %c0_16] : memref<8x4x128xf32, #tpu.memory_space<vmem>>, vector<8x1x128xf32>
    %14 = vector.shape_cast %13 : vector<8x1x128xf32> to vector<8x128xf32>
    %15 = vector.shape_cast %12 : vector<8x128xf32> to vector<8x1x128xf32>
    tpu.vector_store %arg3[%c0_14, %c1_15, %c0_16], %15 {strides = array<i32>} : memref<8x4x128xf32, #tpu.memory_space<vmem>>, vector<8x1x128xf32>,
    %c0_17 = arith.constant 0 : index
    %c2 = arith.constant 2 : index
    %c0_18 = arith.constant 0 : index
    %16 = vector.load %arg1[%c0_17, %c2, %c0_18] : memref<8x4x32xf32, #tpu.memory_space<vmem>>, vector<8x1x32xf32>
    %17 = vector.shape_cast %16 : vector<8x1x32xf32> to vector<8x32xf32>
    %c2_19 = arith.constant 2 : index
    %c0_20 = arith.constant 0 : index
    %c0_21 = arith.constant 0 : index
    %18 = vector.load %arg2[%c2_19, %c0_20, %c0_21] : memref<4x32x128xf32, #tpu.memory_space<vmem>>, vector<1x32x128xf32>
    %19 = vector.shape_cast %18 : vector<1x32x128xf32> to vector<32x128xf32>
    %cst_22 = arith.constant dense<0.000000e+00> : vector<8x128xf32>
    %20 = tpu.matmul %17, %19, %cst_22 {dimension_numbers = #tpu.dot_dimension_numbers<[1], [0], [0], [1], [0, 0, 1, 1], [], []>} : vector<8x32xf32>, vector<32x128xf32>, vector<8x128xf32> -> vector<8x128xf32>
    %c0_23 = arith.constant 0 : index
    %c2_24 = arith.constant 2 : index
    %c0_25 = arith.constant 0 : index
    %21 = vector.load %arg3[%c0_23, %c2_24, %c0_25] : memref<8x4x128xf32, #tpu.memory_space<vmem>>, vector<8x1x128xf32>
    %22 = vector.shape_cast %21 : vector<8x1x128xf32> to vector<8x128xf32>
    %23 = vector.shape_cast %20 : vector<8x128xf32> to vector<8x1x128xf32>
    tpu.vector_store %arg3[%c0_23, %c2_24, %c0_25], %23 {strides = array<i32>} : memref<8x4x128xf32, #tpu.memory_space<vmem>>, vector<8x1x128xf32>,
    %c0_26 = arith.constant 0 : index
    %c3 = arith.constant 3 : index
    %c0_27 = arith.constant 0 : index
    %24 = vector.load %arg1[%c0_26, %c3, %c0_27] : memref<8x4x32xf32, #tpu.memory_space<vmem>>, vector<8x1x32xf32>
    %25 = vector.shape_cast %24 : vector<8x1x32xf32> to vector<8x32xf32>
    %c3_28 = arith.constant 3 : index
    %c0_29 = arith.constant 0 : index
    %c0_30 = arith.constant 0 : index
    %26 = vector.load %arg2[%c3_28, %c0_29, %c0_30] : memref<4x32x128xf32, #tpu.memory_space<vmem>>, vector<1x32x128xf32>
    %27 = vector.shape_cast %26 : vector<1x32x128xf32> to vector<32x128xf32>
    %cst_31 = arith.constant dense<0.000000e+00> : vector<8x128xf32>
    %28 = tpu.matmul %25, %27, %cst_31 {dimension_numbers = #tpu.dot_dimension_numbers<[1], [0], [0], [1], [0, 0, 1, 1], [], []>} : vector<8x32xf32>, vector<32x128xf32>, vector<8x128xf32> -> vector<8x128xf32>
    %c0_32 = arith.constant 0 : index
    %c3_33 = arith.constant 3 : index
    %c0_34 = arith.constant 0 : index
    %29 = vector.load %arg3[%c0_32, %c3_33, %c0_34] : memref<8x4x128xf32, #tpu.memory_space<vmem>>, vector<8x1x128xf32>
    %30 = vector.shape_cast %29 : vector<8x1x128xf32> to vector<8x128xf32>
    %31 = vector.shape_cast %28 : vector<8x128xf32> to vector<8x1x128xf32>
    tpu.vector_store %arg3[%c0_32, %c3_33, %c0_34], %31 {strides = array<i32>} : memref<8x4x128xf32, #tpu.memory_space<vmem>>, vector<8x1x128xf32>,
    return
  }
  func.func @transform_0(%arg0: i32) -> (i32, i32, i32) {
    %c0_i32 = arith.constant 0 : i32
    %c0_i32_0 = arith.constant 0 : i32
    %c0_i32_1 = arith.constant 0 : i32
    return %arg0, %c0_i32, %c0_i32_0 : i32, i32, i32
  }
  func.func @transform_1(%arg0: i32) -> (i32, i32, i32) {
    %c0_i32 = arith.constant 0 : i32
    %c0_i32_0 = arith.constant 0 : i32
    %c0_i32_1 = arith.constant 0 : i32
    %c0_i32_2 = arith.constant 0 : i32
    return %c0_i32, %c0_i32_0, %c0_i32_1 : i32, i32, i32
  }
  func.func @transform_2(%arg0: i32) -> (i32, i32, i32) {
    %c0_i32 = arith.constant 0 : i32
    %c0_i32_0 = arith.constant 0 : i32
    %c0_i32_1 = arith.constant 0 : i32
    return %arg0, %c0_i32, %c0_i32_0 : i32, i32, i32
  }
}

</mosaic_0001>

<bundles_post_ra>
// kernel: tpu_custom_call.1
= control target key start
LH: loop header
LB: loop body
LE: loop exit
PB: predicated region body
PF: predicated region fallthrough
CT: control target
= control target key end

     0   :  { %7 = vsyncpa [#allocation3], 0  ;;  %s1090_s0 = inlined_call_operand.hbm [shape: f32[8,4,32], index: 0, kind: input, shape index: {}]   ;;  %s1091_s1 = inlined_call_operand.hbm [shape: f32[4,32,128], index: 1, kind: input, shape index: {}]   ;;  %s1092_s2 = inlined_call_operand.hbm [shape: f32[8,4,128], index: 2, kind: output, shape index: {}]  }
   0x1   :  { %8 = vsyncpa [#allocation6], 0 }
   0x2   :  { %9 = vsyncpa [#allocation4], 0  ;;  %s948_s9 = smov [#allocation2]   ;;  %s876_s13 = scalar_lea.hbm %s1090_s0, 512 }
   0x3   :  { %s15_s10 = sshll.u32 %s948_s9, 4  ;;  %p877_p0 = scmp.ne.s32.totalorder %s1090_s0, %s876_s13  ;;  %s16_s10 = int_to_ptr.vmem [resolvable:$true] %s15_s10 }
   0x4   :  { %p880_p1 = scmp.lt.u32.totalorder %s876_s13, %s1090_s0 }
   0x6   :  { %p882_p2 = pnand %p880_p1, %p877_p0 }
   0x8   :  { %885 = shalt.err (!%p882_p2)
}
   0x9   :  { %s886_s18 = scalar_lea.vmem %s16_s10, 512  ;;  %p891_p4 = scmp.lt.s32.totalorder %s16_s10, %s16_s10 }
   0xa   :  { %p887_p3 = scmp.ne.s32.totalorder %s16_s10, %s886_s18  ;;  %p892_p5 = scmp.lt.s32.totalorder %s886_s18, %s886_s18 }
   0xc   :  { %p893_p6 = por %p892_p5, %p891_p4 }
   0xe   :  { %p894_p7 = pnand %p893_p6, %p887_p3 }
  0x10   :  { %897 = shalt.err (!%p894_p7)
}
  0x11   :  { %s949_s19 = smov 64   ;;  %s950_s20 = smov 4  }
  0x12   :  { %21 = dma.hbm_to_vmem [thread:$0]  %s1090_s0, 512, %s16_s10, [#allocation3], %s949_s19, %s949_s19, %s950_s20  }
  0x13   :  { %s951_s23 = smov [#allocation5]   ;;  %s898_s27 = scalar_lea.hbm %s1091_s1, 2048 }
  0x14   :  { %s27_s24 = sshll.u32 %s951_s23, 4  ;;  %p899_p8 = scmp.ne.s32.totalorder %s1091_s1, %s898_s27  ;;  %s28_s24 = int_to_ptr.vmem [resolvable:$true] %s27_s24 }
  0x15   :  { %p902_p9 = scmp.lt.u32.totalorder %s898_s27, %s1091_s1 }
  0x17   :  { %p904_p10 = pnand %p902_p9, %p899_p8 }
  0x19   :  { %907 = shalt.err (!%p904_p10)
}
  0x1a   :  { %s908_s4 = scalar_lea.vmem %s28_s24, 2048  ;;  %p913_p12 = scmp.lt.s32.totalorder %s28_s24, %s28_s24 }
  0x1b   :  { %p909_p11 = scmp.ne.s32.totalorder %s28_s24, %s908_s4  ;;  %p914_p13 = scmp.lt.s32.totalorder %s908_s4, %s908_s4 }
  0x1d   :  { %p915_p0 = por %p914_p13, %p913_p12 }
  0x1f   :  { %p916_p1 = pnand %p915_p0, %p909_p11 }
  0x21   :  { %919 = shalt.err (!%p916_p1)
}
  0x22   :  { %s952_s0 = smov 128   ;;  %s953_s5 = smov 8  }
  0x23   :  { %33 = dma.hbm_to_vmem [thread:$0]  %s1091_s1, 2048, %s28_s24, [#allocation6], %s952_s0, %s952_s0, %s953_s5  }
  0x24   :  { %942 = dma.done.wait [#allocation3], 512  }
  0x25   :  { %943 = vsyncadd [#allocation3], 4294966784 }
  0x26   :  { %944 = dma.done.wait [#allocation6], 2048  }
  0x27   :  { %945 = vsyncadd [#allocation6], 4294965248  ;;  %v954_v0 = vmov 0.0|0.0   ;;  %vm955_vm0 = vmmov 0   ;;  %v956_v1 = vmov 0.0   ;;  %v48_v2 = vld [vmem:[#allocation5] sm:$0xff] }
  0x28   :  { %841 = vmatprep.subr.bf16.mxu0 %v954_v0  ;;  %847 = vmatprep.subr.bf16.mxu1 %v954_v0  ;;  %v49_v3 = vld [vmem:[#allocation5 + $0x8] sm:$0xff]  ;;  %v229_v4 = vld [vmem:[#allocation5 + $0x20] sm:$0xff]  ;;  %vm61_vm1 = vcmask 1041409   ;;  %vm64_vm2 = vcmask 1042434   ;;  %v50_v7 = vld [vmem:[#allocation5 + $0x10] sm:$0xff]  ;;  %vm67_vm3 = vcmask 1043459  }
  0x29   :  { %805 = vmatprep.mubr.msk.f32.mxu0 %vm955_vm0, %v956_v1  ;;  %816 = vmatprep.mubr.msk.f32.mxu1 %vm955_vm0, %v956_v1  ;;  %v842_v5 = vpack.c.bf16 %v49_v3, %v48_v2  ;;  %v230_v6 = vld [vmem:[#allocation5 + $0x28] sm:$0xff]  ;;  %v51_v8 = vld [vmem:[#allocation5 + $0x18] sm:$0xff]  ;;  %vm70_vm4 = vcmask 1044484   ;;  %vm73_vm5 = vcmask 1045509   ;;  %v231_v10 = vld [vmem:[#allocation5 + $0x30] sm:$0xff]  ;;  %vm76_vm6 = vcmask 1046534  }
  0x2a   :  { %v848_v9 = vpack.c.bf16 %v230_v6, %v229_v4  ;;  %v232_v11 = vld [vmem:[#allocation5 + $0x38] sm:$0xff]  ;;  %v40_v12 = vld [vmem:[#allocation2] sm:$0x1]  ;;  %vm79_vm7 = vcmask 1047559   ;;  %v845_v13 = vpack.c.bf16 %v51_v8, %v50_v7  ;;  %v41_v14 = vld [vmem:[#allocation2 + $0x4] sm:$0x1] }
  0x2b   :  { %843 = vmatpush3.bf16.msra.mxu0 %v842_v5  ;;  %v42_v15 = vld [vmem:[#allocation2 + $0x8] sm:$0x1]  ;;  %v43_v16 = vld [vmem:[#allocation2 + $0xc] sm:$0x1]  ;;  %vm81_vm8 = vcmask 261120   ;;  %v851_v17 = vpack.c.bf16 %v232_v11, %v231_v10  ;;  %v60_v22 = vrot.slane %v41_v14, 7 }
  0x2c   :  { %849 = vmatpush3.bf16.msra.mxu1 %v848_v9  ;;  %844 = vmatprep.subr.bf16.mxu0 %v954_v0  ;;  %v44_v18 = vld [vmem:[#allocation2 + $0x10] sm:$0x1]  ;;  %v45_v19 = vld [vmem:[#allocation2 + $0x14] sm:$0x1]  ;;  %v46_v20 = vld [vmem:[#allocation2 + $0x18] sm:$0x1] }
  0x2d   :  { %850 = vmatprep.subr.bf16.mxu1 %v954_v0  ;;  %v47_v21 = vld [vmem:[#allocation2 + $0x1c] sm:$0x1]  ;;  %v63_v23 = vrot.slane %v42_v15, 6  ;;  %v66_v24 = vrot.slane %v43_v16, 5  ;;  %v69_v25 = vrot.slane %v44_v18, 4  ;;  %v72_v26 = vrot.slane %v45_v19, 3 }
  0x2e   :  { %v75_v27 = vrot.slane %v46_v20, 2  ;;  %v78_v28 = vrot.slane %v47_v21, 1  ;;  %v220_v29 = vld [vmem:[#allocation2 + $0x1] sm:$0x1]  ;;  %v62_v31 = vsel %vm61_vm1, %v60_v22, %v40_v12  ;;  %v221_v32 = vld [vmem:[#allocation2 + $0x5] sm:$0x1] }
  0x2f   :  { %v402_v30 = vld [vmem:[#allocation5 + $0x40] sm:$0xff]  ;;  %846 = vmatpush3.bf16.msra.mxu0 %v845_v13  ;;  %v222_v33 = vld [vmem:[#allocation2 + $0x9] sm:$0x1]  ;;  %v223_v34 = vld [vmem:[#allocation2 + $0xd] sm:$0x1]  ;;  %v65_v35 = vsel %vm64_vm2, %v63_v23, %v62_v31  ;;  %v241_v41 = vrot.slane %v221_v32, 7 }
  0x30   :  { %852 = vmatpush3.bf16.msra.mxu1 %v851_v17  ;;  %v224_v36 = vld [vmem:[#allocation2 + $0x11] sm:$0x1]  ;;  %v225_v37 = vld [vmem:[#allocation2 + $0x15] sm:$0x1]  ;;  %v226_v38 = vld [vmem:[#allocation2 + $0x19] sm:$0x1]  ;;  %853 = vmatprep.subr.bf16.mxu0 %v954_v0  ;;  %v68_v39 = vsel %vm67_vm3, %v66_v24, %v65_v35 }
  0x31   :  { %v227_v40 = vld [vmem:[#allocation2 + $0x1d] sm:$0x1]  ;;  %v243_v42 = vrot.slane %v222_v33, 6  ;;  %v245_v43 = vrot.slane %v223_v34, 5  ;;  %859 = vmatprep.subr.bf16.mxu1 %v954_v0  ;;  %v403_v44 = vld [vmem:[#allocation5 + $0x48] sm:$0xff]  ;;  %v71_v45 = vsel %vm70_vm4, %v69_v25, %v68_v39  ;;  %v247_v46 = vrot.slane %v224_v36, 4 }
  0x32   :  { %v249_v47 = vrot.slane %v225_v37, 3  ;;  %v251_v48 = vrot.slane %v226_v38, 2  ;;  %v575_v49 = vld [vmem:[#allocation5 + $0x60] sm:$0xff]  ;;  %v74_v50 = vsel %vm73_vm5, %v72_v26, %v71_v45  ;;  %v242_v51 = vsel %vm61_vm1, %v241_v41, %v220_v29  ;;  %v576_v54 = vld [vmem:[#allocation5 + $0x68] sm:$0xff]  ;;  %v404_v55 = vld [vmem:[#allocation5 + $0x50] sm:$0xff]  ;;  %s958_s1 = smov [#allocation7]  }
  0x33   :  { %v253_v52 = vrot.slane %v227_v40, 1  ;;  %v854_v53 = vpack.c.bf16 %v403_v44, %v402_v30  ;;  %v405_v56 = vld [vmem:[#allocation5 + $0x58] sm:$0xff]  ;;  %v77_v57 = vsel %vm76_vm6, %v75_v27, %v74_v50  ;;  %v244_v58 = vsel %vm64_vm2, %v243_v42, %v242_v51  ;;  %v393_v59 = vld [vmem:[#allocation2 + $0x2] sm:$0x1]  ;;  %v394_v60 = vld [vmem:[#allocation2 + $0x6] sm:$0x1] }
  0x34   :  { %v395_v61 = vld [vmem:[#allocation2 + $0xa] sm:$0x1]  ;;  %v80_v62 = vsel %vm79_vm7, %v78_v28, %v77_v57  ;;  %v246_v63 = vsel %vm67_vm3, %v245_v43, %v244_v58  ;;  %v396_v2 = vld [vmem:[#allocation2 + $0xe] sm:$0x1]  ;;  %v397_v3 = vld [vmem:[#allocation2 + $0x12] sm:$0x1]  ;;  %v860_v6 = vpack.c.bf16 %v576_v54, %v575_v49  ;;  %v857_v13 = vpack.c.bf16 %v405_v56, %v404_v55 }
  0x35   :  { %v398_v4 = vld [vmem:[#allocation2 + $0x16] sm:$0x1]  ;;  %806 = vmatmul.mubr.msk.f32.vlgmr.msra.gmra.mrb[0].mxu0 %vm81_vm8, %v80_v62  ;;  %v248_v5 = vsel %vm70_vm4, %v247_v46, %v246_v63  ;;  %v578_v8 = vld [vmem:[#allocation5 + $0x78] sm:$0xff]  ;;  %v414_v10 = vrot.slane %v394_v60, 7  ;;  %v416_v11 = vrot.slane %v395_v61, 6  ;;  %v418_v15 = vrot.slane %v396_v2, 5 }
  0x36   :  { %v577_v7 = vld [vmem:[#allocation5 + $0x70] sm:$0xff]  ;;  %v399_v9 = vld [vmem:[#allocation2 + $0x1a] sm:$0x1]  ;;  %v250_v12 = vsel %vm73_vm5, %v249_v47, %v248_v5  ;;  %855 = vmatpush3.bf16.msra.mxu0 %v854_v53  ;;  %827 = vmatprep.mubr.msk.f32.mxu0 %vm955_vm0, %v956_v1  ;;  %v400_v14 = vld [vmem:[#allocation2 + $0x1e] sm:$0x1]  ;;  %v420_v16 = vrot.slane %v397_v3, 4 }
  0x37   :  { %v566_v17 = vld [vmem:[#allocation2 + $0x3] sm:$0x1]  ;;  %v252_v18 = vsel %vm76_vm6, %v251_v48, %v250_v12  ;;  %856 = vmatprep.subr.bf16.mxu0 %v954_v0  ;;  %v415_v19 = vsel %vm61_vm1, %v414_v10, %v393_v59  ;;  %v422_v20 = vrot.slane %v398_v4, 3  ;;  %v424_v21 = vrot.slane %v399_v9, 2  ;;  %v567_v22 = vld [vmem:[#allocation2 + $0x7] sm:$0x1] }
  0x38   :  { %v568_v23 = vld [vmem:[#allocation2 + $0xb] sm:$0x1]  ;;  %v254_v24 = vsel %vm79_vm7, %v253_v52, %v252_v18  ;;  %v417_v25 = vsel %vm64_vm2, %v416_v11, %v415_v19  ;;  %v569_v26 = vld [vmem:[#allocation2 + $0xf] sm:$0x1]  ;;  %v570_v27 = vld [vmem:[#allocation2 + $0x13] sm:$0x1]  ;;  %v863_v34 = vpack.c.bf16 %v578_v8, %v577_v7  ;;  %v159_v52 = vlaneseq }
  0x39   :  { %v571_v28 = vld [vmem:[#allocation2 + $0x17] sm:$0x1]  ;;  %817 = vmatmul.mubr.msk.f32.vlgmr.msra.gmra.mrb[0].mxu1 %vm81_vm8, %v254_v24  ;;  %v419_v29 = vsel %vm67_vm3, %v418_v15, %v417_v25  ;;  %v426_v30 = vrot.slane %v400_v14, 1  ;;  %v572_v31 = vld [vmem:[#allocation2 + $0x1b] sm:$0x1]  ;;  %v587_v32 = vrot.slane %v567_v22, 7 }
  0x3a   :  { %v589_v33 = vrot.slane %v568_v23, 6  ;;  %861 = vmatpush3.bf16.msra.mxu1 %v860_v6  ;;  %858 = vmatpush3.bf16.msra.mxu0 %v857_v13  ;;  %v421_v35 = vsel %vm70_vm4, %v420_v16, %v419_v29  ;;  %v573_v36 = vld [vmem:[#allocation2 + $0x1f] sm:$0x1]  ;;  %v591_v37 = vrot.slane %v569_v26, 5  ;;  %v593_v38 = vrot.slane %v570_v27, 4  ;;  %s744_s8 = sshll.u32 %s958_s1, 4  ;;  %s745_s8 = int_to_ptr.vmem [resolvable:$true] %s744_s8 }
  0x3b   :  { %862 = vmatprep.subr.bf16.mxu1 %v954_v0  ;;  %838 = vmatprep.mubr.msk.f32.mxu1 %vm955_vm0, %v956_v1  ;;  %v423_v39 = vsel %vm73_vm5, %v422_v20, %v421_v35  ;;  %v588_v40 = vsel %vm61_vm1, %v587_v32, %v566_v17  ;;  %v595_v41 = vrot.slane %v571_v28, 3  ;;  %v597_v44 = vrot.slane %v572_v31, 2  ;;  %s920_s9 = scalar_lea.vmem %s745_s8, 512  ;;  %p925_p3 = scmp.lt.s32.totalorder %s745_s8, %s745_s8 }
  0x3c   :  { %v425_v42 = vsel %vm76_vm6, %v424_v21, %v423_v39  ;;  %v590_v43 = vsel %vm64_vm2, %v589_v33, %v588_v40  ;;  %v599_v47 = vrot.slane %v573_v36, 1  ;;  %v957_v50 = vmov 1966171168   ;;  %p921_p2 = scmp.ne.s32.totalorder %s745_s8, %s920_s9  ;;  %p926_p4 = scmp.lt.s32.totalorder %s920_s9, %s920_s9 }
  0x3d   :  { %v427_v45 = vsel %vm79_vm7, %v426_v30, %v425_v42  ;;  %v592_v46 = vsel %vm67_vm3, %v591_v37, %v590_v43  ;;  %v157_v51 = vunpack.c.l.s4 %v957_v50  ;;  %v160_v54 = vshrl.u32 %v159_v52, 7 }
  0x3e   :  { %864 = vmatpush3.bf16.msra.mxu1 %v863_v34  ;;  %828 = vmatmul.mubr.msk.f32.vlgmr.msra.gmra.mrb[2].mxu0 %vm81_vm8, %v427_v45  ;;  %v594_v0 = vsel %vm70_vm4, %v593_v38, %v592_v46  ;;  %p927_p5 = por %p926_p4, %p925_p3 }
  0x3f   :  { %v596_v1 = vsel %vm73_vm5, %v595_v41, %v594_v0  ;;  %v158_v53 = vunpack.c.0.s8 %v157_v51 }
  0x40   :  { %v598_v48 = vsel %vm76_vm6, %v597_v44, %v596_v1  ;;  %p928_p6 = pnand %p927_p5, %p921_p2 }
  0x41   :  { %v600_v49 = vsel %vm79_vm7, %v599_v47, %v598_v48  ;;  %v1049_v55 = vsub.s32 %v158_v53, %v160_v54 }
  0x42   :  { %839 = vmatmul.mubr.msk.f32.vlgmr.msra.gmra.mrb[2].mxu1 %vm81_vm8, %v600_v49 }
 0x108   :  { %v150_v56 = vpop.f32.mrb[0].mxu0 }
 0x109   :  { %v155_v57 = vcombine.high %v150_v56, %v150_v56  ;;  %v162_v58 = vrot.slane %v150_v56, %v1049_v55  ;;  %v807_v59 = vpop.f32.mrb[1].mxu0 }
 0x10b   :  { %v169_v60 = vrot.slane %v155_v57, %v1049_v55  ;;  %v170_v61 = vcombine.high %v162_v58, %v162_v58  ;;  %v178_v62 = vrot.slane %v162_v58, %v1049_v55  ;;  %758 = vst.sshfl [vmem:[#allocation7] sm:$0x1 pattern:$0x73625140] %v162_v58 }
 0x10c   :  { %v323_v63 = vpop.f32.mrb[0].mxu1 }
 0x10d   :  { %v171_v2 = vcombine.high %v169_v60, %v169_v60  ;;  %v185_v3 = vrot.slane %v169_v60, %v1049_v55  ;;  %v192_v4 = vrot.slane %v170_v61, %v1049_v55  ;;  %v200_v5 = vcombine.high %v178_v62, %v178_v62  ;;  %759 = vst.sshfl [vmem:[#allocation7 + $0x4] sm:$0x1 pattern:$0x73625140] %v170_v61  ;;  %v818_v6 = vpop.f32.mrb[1].mxu1 }
 0x10e   :  { %760 = vst.sshfl [vmem:[#allocation7 + $0x10] sm:$0x1 pattern:$0x73625140] %v169_v60  ;;  %v328_v7 = vcombine.high %v323_v63, %v323_v63  ;;  %v335_v8 = vrot.slane %v323_v63, %v1049_v55 }
 0x10f   :  { %v199_v9 = vrot.slane %v171_v2, %v1049_v55  ;;  %v201_v10 = vcombine.high %v185_v3, %v185_v3  ;;  %v202_v11 = vcombine.high %v192_v4, %v192_v4  ;;  %214 = vst [vmem:[#allocation7 + $0x8] sm:$0x1] %v200_v5  ;;  %761 = vst.sshfl [vmem:[#allocation7 + $0x14] sm:$0x1 pattern:$0x73625140] %v171_v2 }
 0x110   :  { %v342_v12 = vrot.slane %v328_v7, %v1049_v55  ;;  %v343_v13 = vcombine.high %v335_v8, %v335_v8  ;;  %v351_v14 = vrot.slane %v335_v8, %v1049_v55  ;;  %763 = vst.sshfl [vmem:[#allocation7 + $0x1] sm:$0x1 pattern:$0x73625140] %v335_v8 }
 0x111   :  { %v203_v15 = vcombine.high %v199_v9, %v199_v9  ;;  %215 = vst [vmem:[#allocation7 + $0xc] sm:$0x1] %v202_v11  ;;  %218 = vst [vmem:[#allocation7 + $0x18] sm:$0x1] %v201_v10  ;;  %v496_v16 = vpop.f32.mrb[2].mxu0 }
 0x112   :  { %v344_v17 = vcombine.high %v342_v12, %v342_v12  ;;  %v358_v18 = vrot.slane %v342_v12, %v1049_v55  ;;  %v365_v19 = vrot.slane %v343_v13, %v1049_v55  ;;  %v373_v20 = vcombine.high %v351_v14, %v351_v14  ;;  %764 = vst.sshfl [vmem:[#allocation7 + $0x5] sm:$0x1 pattern:$0x73625140] %v343_v13  ;;  %v829_v21 = vpop.f32.mrb[3].mxu0 }
 0x113   :  { %765 = vst.sshfl [vmem:[#allocation7 + $0x11] sm:$0x1 pattern:$0x73625140] %v342_v12  ;;  %219 = vst [vmem:[#allocation7 + $0x1c] sm:$0x1] %v203_v15  ;;  %v501_v22 = vcombine.high %v496_v16, %v496_v16  ;;  %v508_v23 = vrot.slane %v496_v16, %v1049_v55 }
 0x114   :  { %v372_v24 = vrot.slane %v344_v17, %v1049_v55  ;;  %v374_v25 = vcombine.high %v358_v18, %v358_v18  ;;  %v375_v26 = vcombine.high %v365_v19, %v365_v19  ;;  %387 = vst [vmem:[#allocation7 + $0x9] sm:$0x1] %v373_v20  ;;  %766 = vst.sshfl [vmem:[#allocation7 + $0x15] sm:$0x1 pattern:$0x73625140] %v344_v17 }
 0x115   :  { %v515_v27 = vrot.slane %v501_v22, %v1049_v55  ;;  %v516_v28 = vcombine.high %v508_v23, %v508_v23  ;;  %v524_v29 = vrot.slane %v508_v23, %v1049_v55  ;;  %768 = vst.sshfl [vmem:[#allocation7 + $0x2] sm:$0x1 pattern:$0x73625140] %v508_v23  ;;  %v669_v30 = vpop.f32.mrb[2].mxu1 }
 0x116   :  { %v376_v31 = vcombine.high %v372_v24, %v372_v24  ;;  %388 = vst [vmem:[#allocation7 + $0xd] sm:$0x1] %v375_v26  ;;  %391 = vst [vmem:[#allocation7 + $0x19] sm:$0x1] %v374_v25  ;;  %v674_v32 = vcombine.high %v669_v30, %v669_v30  ;;  %v681_v33 = vrot.slane %v669_v30, %v1049_v55  ;;  %v840_v34 = vpop.f32.mrb[3].mxu1 }
 0x117   :  { %v517_v35 = vcombine.high %v515_v27, %v515_v27  ;;  %v531_v36 = vrot.slane %v515_v27, %v1049_v55  ;;  %v538_v37 = vrot.slane %v516_v28, %v1049_v55  ;;  %v546_v38 = vcombine.high %v524_v29, %v524_v29  ;;  %769 = vst.sshfl [vmem:[#allocation7 + $0x6] sm:$0x1 pattern:$0x73625140] %v516_v28 }
 0x118   :  { %770 = vst.sshfl [vmem:[#allocation7 + $0x12] sm:$0x1 pattern:$0x73625140] %v515_v27  ;;  %392 = vst [vmem:[#allocation7 + $0x1d] sm:$0x1] %v376_v31  ;;  %v688_v39 = vrot.slane %v674_v32, %v1049_v55  ;;  %v689_v40 = vcombine.high %v681_v33, %v681_v33  ;;  %v697_v41 = vrot.slane %v681_v33, %v1049_v55 }
 0x119   :  { %773 = vst.sshfl [vmem:[#allocation7 + $0x3] sm:$0x1 pattern:$0x73625140] %v681_v33  ;;  %v545_v42 = vrot.slane %v517_v35, %v1049_v55  ;;  %v547_v43 = vcombine.high %v531_v36, %v531_v36  ;;  %v548_v44 = vcombine.high %v538_v37, %v538_v37  ;;  %560 = vst [vmem:[#allocation7 + $0xa] sm:$0x1] %v546_v38 }
 0x11a   :  { %771 = vst.sshfl [vmem:[#allocation7 + $0x16] sm:$0x1 pattern:$0x73625140] %v517_v35  ;;  %v690_v45 = vcombine.high %v688_v39, %v688_v39  ;;  %v704_v46 = vrot.slane %v688_v39, %v1049_v55  ;;  %v711_v47 = vrot.slane %v689_v40, %v1049_v55  ;;  %v719_v0 = vcombine.high %v697_v41, %v697_v41 }
 0x11b   :  { %774 = vst.sshfl [vmem:[#allocation7 + $0x7] sm:$0x1 pattern:$0x73625140] %v689_v40  ;;  %v549_v1 = vcombine.high %v545_v42, %v545_v42  ;;  %561 = vst [vmem:[#allocation7 + $0xe] sm:$0x1] %v548_v44 }
 0x11c   :  { %775 = vst.sshfl [vmem:[#allocation7 + $0x13] sm:$0x1 pattern:$0x73625140] %v688_v39  ;;  %564 = vst [vmem:[#allocation7 + $0x1a] sm:$0x1] %v547_v43  ;;  %v718_v48 = vrot.slane %v690_v45, %v1049_v55  ;;  %v720_v49 = vcombine.high %v704_v46, %v704_v46  ;;  %v721_v50 = vcombine.high %v711_v47, %v711_v47 }
 0x11d   :  { %733 = vst [vmem:[#allocation7 + $0xb] sm:$0x1] %v719_v0  ;;  %776 = vst.sshfl [vmem:[#allocation7 + $0x17] sm:$0x1 pattern:$0x73625140] %v690_v45 }
 0x11e   :  { %565 = vst [vmem:[#allocation7 + $0x1e] sm:$0x1] %v549_v1  ;;  %v722_v51 = vcombine.high %v718_v48, %v718_v48  ;;  %734 = vst [vmem:[#allocation7 + $0xf] sm:$0x1] %v721_v50 }
 0x11f   :  { %737 = vst [vmem:[#allocation7 + $0x1b] sm:$0x1] %v720_v49 }
 0x120   :  { %738 = vst [vmem:[#allocation7 + $0x1f] sm:$0x1] %v722_v51 }
 0x121   :  { %931 = shalt.err (!%p928_p6)
}
 0x122   :  { %s932_s12 = scalar_lea.hbm %s1092_s2, 512 }
 0x123   :  { %p933_p7 = scmp.ne.s32.totalorder %s1092_s2, %s932_s12  ;;  %p936_p8 = scmp.lt.u32.totalorder %s932_s12, %s1092_s2 }
 0x125   :  { %p938_p9 = pnand %p936_p8, %p933_p7 }
 0x127   :  { %941 = shalt.err (!%p938_p9)
}
 0x128   :  { %750 = dma.vmem_to_hbm [thread:$0]  %s745_s8, 512, %s1092_s2, [#allocation4], %s949_s19, %s949_s19, %s950_s20  }
 0x129   :  { %946 = dma.done.wait [#allocation4], 512  }
 0x12a   :  { %947 = vsyncadd [#allocation4], 4294966784 }
 0x12b   :  { %754 = vsyncpa [#allocation3], 1 }
 0x12c   :  { %755 = vsyncpa [#allocation6], 1 }
 0x12d   :  { %756 = vsyncpa [#allocation4], 1 }

</bundles_post_ra>
